<compile_context>
chip_gen: v7x
topology: tpu7x:2x2x1
jax: 0.10.0
libtpu: 0.0.40
codegen_flags: <defaults>
</compile_context>

<pallas_src>
import functools

import jax
import jax.numpy as jnp
from jax.experimental import pallas as pl
from jax.experimental.pallas import tpu as pltpu

_BF16 = 2
_F32 = 4


def _round_up(x, m):
    return ((x + m - 1) // m) * m


def _pick_tile_m(batch, max_bm):
    """Largest batch tile <= max_bm that evenly divides the 128-padded batch."""
    m128 = _round_up(batch, 128)
    for bm in (512, 384, 256, 128):
        if bm <= max_bm and bm <= m128 and m128 % bm == 0:
            return bm, m128
    return 128, m128


def _pick_chunk(h_pad, max_chunk=512):
    """Lane-dense hidden/output chunk (multiple of 128 dividing h_pad)."""
    for c in (512, 256, 128):
        if c <= max_chunk and c <= h_pad and h_pad % c == 0:
            return c
    return min(h_pad, 128)


def _vmem_budget_bytes():
    """Usable per-core VMEM with headroom (v7x: 64 MiB; v5e/v6e: 128 MiB)."""
    cap = 64 * 2**20  # conservative default = v7x per-TensorCore VMEM
    try:
        cap = int(pltpu.get_tpu_info().vmem_capacity_bytes)
    except Exception:  # info query only; never gates correctness
        pass
    return max(cap - 8 * 2**20, cap * 3 // 4)


@functools.lru_cache(maxsize=None)
def _single_buffer_kwargs():
    """Capability check (spec construction only, no compile) for pl.Buffered(1)."""
    if not hasattr(pl, "Buffered"):
        return {}
    try:
        pl.BlockSpec((8, 128), lambda i: (0, 0), pipeline_mode=pl.Buffered(1))
    except TypeError:
        return {}
    # Constant index map -> the block never changes; one buffer halves resident VMEM.
    return {"pipeline_mode": pl.Buffered(1)}


def _mlp_resident_kernel(x_ref, w1_ref, b1_ref, w2_ref, b2_ref, o_ref, h_ref, *, chunk):
    """Fused Linear -> ReLU -> (eval Dropout) -> Linear; all weights VMEM-resident.

    Grid = (batch tiles,). Both matmuls are chunked over `chunk`-wide lane slices
    (bounds f32 temporaries); activations live in a bf16 VMEM scratch between layers.
    """
    h_pad = w1_ref.shape[1]
    # Layer 1: h = relu(x @ W1 + b1), written slice-by-slice into the bf16 scratch.
    for j in range(h_pad // chunk):
        s = slice(j * chunk, (j + 1) * chunk)
        acc = jnp.dot(x_ref[...], w1_ref[:, s], preferred_element_type=jnp.float32)
        h_ref[:, s] = jnp.maximum(acc + b1_ref[:, s], 0.0).astype(h_ref.dtype)
    # Dropout(p=0.5) in eval mode == identity.
    # TODO(synk): training-mode dropout (pltpu.prng_random_bits mask + 1/(1-p) scale) not emitted.
    # Layer 2: out = h @ W2 + b2, chunked over the output dim.
    for j in range(h_pad // chunk):
        s = slice(j * chunk, (j + 1) * chunk)
        acc = jnp.dot(h_ref[...], w2_ref[:, s], preferred_element_type=jnp.float32)
        o_ref[:, s] = (acc + b2_ref[:, s]).astype(o_ref.dtype)


def _mlp_streamed_kernel(x_ref, w1_ref, b1_ref, w2_ref, b2_ref, o_ref, h_ref, *, chunk):
    """Same fusion, but W2/b2 are N-tiled over grid axis 1 (streamed per batch tile).

    Layer 1 runs once per batch tile (n == 0) into the bf16 scratch, which is
    reused for every layer-2 N tile. The n axis must stay innermost + sequential.
    """
    n = pl.program_id(1)

    @pl.when(n == 0)
    def _():
        h_pad = w1_ref.shape[1]
        for j in range(h_pad // chunk):
            s = slice(j * chunk, (j + 1) * chunk)
            acc = jnp.dot(x_ref[...], w1_ref[:, s], preferred_element_type=jnp.float32)
            h_ref[:, s] = jnp.maximum(acc + b1_ref[:, s], 0.0).astype(h_ref.dtype)
        # Dropout(p=0.5) in eval mode == identity.

    acc = jnp.dot(h_ref[...], w2_ref[...], preferred_element_type=jnp.float32)
    o_ref[...] = (acc + b2_ref[...]).astype(o_ref.dtype)


def prepare_mlp_params(w1, b1, w2, b2):
    """Pad to 128-multiples and bf16-cast the matmul operands ONCE.

    Cache / reuse the result across forward calls: doing this per call would
    re-stream both weight matrices through HBM outside the kernel.
    """
    input_dim, hidden_dim = w1.shape
    assert w2.shape == (hidden_dim, hidden_dim)
    k_pad = _round_up(input_dim, 128)
    h_pad = _round_up(hidden_dim, 128)
    w1p = jnp.zeros((k_pad, h_pad), jnp.bfloat16).at[:input_dim, :hidden_dim].set(
        w1.astype(jnp.bfloat16))
    w2p = jnp.zeros((h_pad, h_pad), jnp.bfloat16).at[:hidden_dim, :hidden_dim].set(
        w2.astype(jnp.bfloat16))
    b1p = jnp.zeros((1, h_pad), jnp.float32).at[:, :hidden_dim].set(
        jnp.asarray(b1, jnp.float32).reshape(1, -1))
    b2p = jnp.zeros((1, h_pad), jnp.float32).at[:, :hidden_dim].set(
        jnp.asarray(b2, jnp.float32).reshape(1, -1))
    return w1p, b1p, w2p, b2p


def mlp_forward(x, w1p, b1p, w2p, b2p, *, hidden_dim):
    """Fused 2-layer MLP (eval mode): relu(x @ W1 + b1) @ W2 + b2.

    x: [B, input_dim] (unpadded); w1p/b1p/w2p/b2p from prepare_mlp_params.
    bf16 MXU inputs, f32 accumulation, f32 output sliced back to [B, hidden_dim].
    """
    B, input_dim = x.shape
    k_pad, h_pad = w1p.shape
    assert input_dim <= k_pad and hidden_dim <= h_pad

    budget = _vmem_budget_bytes()
    res_kwargs = _single_buffer_kwargs()

    # ---------- choose residency / tiling -------------------------------
    mode = None
    block_m = m_pad = chunk = need = None
    # Resident-W2 path: every weight is DMA'd from HBM exactly once.
    for bm_max in (256, 128):
        block_m, m_pad = _pick_tile_m(B, bm_max)
        chunk = _pick_chunk(h_pad)
        need = (k_pad * h_pad * _BF16 + h_pad * h_pad * _BF16 + 2 * h_pad * _F32  # weights/biases
                + 2 * block_m * k_pad * _BF16                                     # x tile (dbl-buf)
                + 2 * block_m * h_pad * _F32                                      # out tile
                + block_m * h_pad * _BF16)                                        # h scratch
        if need <= budget:
            mode = "resident"
            break
    if mode is None:
        # Streamed-W2 path: W2 re-streamed once per batch tile, so raise block_m
        # (up to 512) to maximise flops per W2 byte.
        for bm_max, bn_max in ((512, 256), (384, 256), (256, 256), (256, 128), (128, 128)):
            block_m, m_pad = _pick_tile_m(B, bm_max)
            chunk = _pick_chunk(h_pad, bn_max)
            need = (k_pad * h_pad * _BF16 + h_pad * _F32             # resident W1/b1
                    + 2 * block_m * k_pad * _BF16                     # x tile
                    + 2 * h_pad * chunk * _BF16 + 2 * chunk * _F32    # W2/b2 N tiles
                    + 2 * block_m * chunk * _F32                      # out tile
                    + block_m * h_pad * _BF16)                        # h scratch
            if need <= budget:
                mode = "streamed"
                break
        if mode is None:
            # TODO(synk): K-tile W1 (pl.ds loop or pltpu.emit_pipeline) when even the
            # streamed footprint exceeds per-core VMEM (very large input_dim*hidden).
            mode = "streamed"

    vmem_limit = int(min(budget, max(need + 4 * 2**20, 16 * 2**20)))
    m_tiles = m_pad // block_m

    # ---------- pad activations (per call; weights already padded) ------
    xp = jnp.zeros((m_pad, k_pad), jnp.bfloat16).at[:B, :input_dim].set(
        x.astype(jnp.bfloat16))

    # ---------- cost hint (includes W2 re-streaming + f32 writeback) ----
    w2_passes = 1 if mode == "resident" else m_tiles
    flops = 2 * m_pad * k_pad * h_pad + 2 * m_pad * h_pad * h_pad
    bytes_accessed = (m_pad * k_pad * _BF16
                      + k_pad * h_pad * _BF16
                      + w2_passes * h_pad * h_pad * _BF16
                      + (1 + w2_passes) * h_pad * _F32
                      + m_pad * h_pad * _F32)
    cost = pl.CostEstimate(flops=int(flops), transcendentals=0,
                           bytes_accessed=int(bytes_accessed))

    # ---------- build the pallas_call -----------------------------------
    if mode == "resident":
        kern = functools.partial(_mlp_resident_kernel, chunk=chunk)
        grid_spec = pltpu.PrefetchScalarGridSpec(
            num_scalar_prefetch=0,
            grid=(m_tiles,),
            in_specs=[
                pl.BlockSpec((block_m, k_pad), lambda i: (i, 0)),
                pl.BlockSpec((k_pad, h_pad), lambda i: (0, 0), **res_kwargs),
                pl.BlockSpec((1, h_pad), lambda i: (0, 0), **res_kwargs),
                pl.BlockSpec((h_pad, h_pad), lambda i: (0, 0), **res_kwargs),
                pl.BlockSpec((1, h_pad), lambda i: (0, 0), **res_kwargs),
            ],
            out_specs=pl.BlockSpec((block_m, h_pad), lambda i: (i, 0)),
            scratch_shapes=[pltpu.VMEM((block_m, h_pad), jnp.bfloat16)],
        )
        dims = ("parallel",)
        # TODO(synk): when m_tiles == 1 the parallel batch axis leaves v7x's second
        # TensorCore idle; a core-split over the hidden dim would recover it.
    else:
        kern = functools.partial(_mlp_streamed_kernel, chunk=chunk)
        grid_spec = pltpu.PrefetchScalarGridSpec(
            num_scalar_prefetch=0,
            grid=(m_tiles, h_pad // chunk),
            in_specs=[
                pl.BlockSpec((block_m, k_pad), lambda i, n: (i, 0)),
                pl.BlockSpec((k_pad, h_pad), lambda i, n: (0, 0), **res_kwargs),
                pl.BlockSpec((1, h_pad), lambda i, n: (0, 0), **res_kwargs),
                pl.BlockSpec((h_pad, chunk), lambda i, n: (0, n)),
                pl.BlockSpec((1, chunk), lambda i, n: (0, n)),
            ],
            out_specs=pl.BlockSpec((block_m, chunk), lambda i, n: (i, n)),
            scratch_shapes=[pltpu.VMEM((block_m, h_pad), jnp.bfloat16)],
        )
        # h_ref is filled at n == 0, so the n axis must stay innermost + sequential.
        dims = ("parallel", "arbitrary")

    out_p = pl.pallas_call(
        kern,
        out_shape=jax.ShapeDtypeStruct((m_pad, h_pad), jnp.float32),
        grid_spec=grid_spec,
        compiler_params=pltpu.CompilerParams(
            dimension_semantics=dims, vmem_limit_bytes=vmem_limit),
        cost_estimate=cost,
    )(xp, w1p, b1p, w2p, b2p)

    return out_p[:B, :hidden_dim].astype(x.dtype)


def init_params(key, input_dim, hidden_dim, dtype=jnp.float32):
    """Mimics torch.nn.Linear default init (U[-1/sqrt(fan_in), 1/sqrt(fan_in)])."""
    k1, k2, k3, k4 = jax.random.split(key, 4)
    bound1 = 1.0 / (input_dim ** 0.5)
    bound2 = 1.0 / (hidden_dim ** 0.5)
    w1 = jax.random.uniform(k1, (input_dim, hidden_dim), dtype, -bound1, bound1)
    b1 = jax.random.uniform(k2, (hidden_dim,), dtype, -bound1, bound1)
    w2 = jax.random.uniform(k3, (hidden_dim, hidden_dim), dtype, -bound2, bound2)
    b2 = jax.random.uniform(k4, (hidden_dim,), dtype, -bound2, bound2)
    return w1, b1, w2, b2


if __name__ == "__main__":
    key = jax.random.PRNGKey(0)
    kx, kp = jax.random.split(key)

    batch = 8
    input_dim = 16
    hidden_dim = 32

    x = jax.random.normal(kx, (batch, input_dim), jnp.float32)
    w1, b1, w2, b2 = init_params(kp, input_dim, hidden_dim)

    # Pad + cast the weights ONCE; only x is padded per forward call.
    params = prepare_mlp_params(w1, b1, w2, b2)
    fwd = jax.jit(functools.partial(mlp_forward, hidden_dim=hidden_dim))

    out = jax.block_until_ready(fwd(x, *params))

    # Pure-JAX reference mirroring the kernel numerics
    # (bf16 matmul inputs, f32 accumulation, eval-mode dropout == identity).
    xb, w1b, w2b = (a.astype(jnp.bfloat16) for a in (x, w1, w2))
    h_ref = jnp.maximum(
        jnp.dot(xb, w1b, preferred_element_type=jnp.float32) + b1.reshape(1, -1), 0.0)
    ref = jnp.dot(h_ref.astype(jnp.bfloat16), w2b,
                  preferred_element_type=jnp.float32) + b2.reshape(1, -1)

    assert out.shape == (batch, hidden_dim)
    assert jnp.allclose(out, ref, atol=1e-2, rtol=1e-2), "mismatch vs reference"

    print("KERNEL_OK")
</pallas_src>

<mosaic_0001>
module attributes {stable_mosaic.version = 11 : i64} {
  func.func @_mlp_resident_kernel(%arg0: i32, %arg1: memref<128x128xbf16, #tpu.memory_space<vmem>>, %arg2: memref<128x128xbf16, #tpu.memory_space<vmem>>, %arg3: memref<1x128xf32, #tpu.memory_space<vmem>>, %arg4: memref<128x128xbf16, #tpu.memory_space<vmem>>, %arg5: memref<1x128xf32, #tpu.memory_space<vmem>>, %arg6: memref<128x128xf32, #tpu.memory_space<vmem>>, %arg7: memref<128x128xbf16, #tpu.memory_space<vmem>>) attributes {dimension_semantics = [#tpu.dimension_semantics<parallel>], iteration_bounds = array<i64: 1>, scalar_prefetch = 0 : i64, scratch_operands = 1 : i64, tpu.core_type = #tpu.core_type<tc>, window_params = [{transform_indices = @transform_0, window_bounds = array<i64: 128, 128>}, {pipeline_mode = #tpu.pipeline_mode<synchronous>, transform_indices = @transform_1, window_bounds = array<i64: 128, 128>}, {pipeline_mode = #tpu.pipeline_mode<synchronous>, transform_indices = @transform_2, window_bounds = array<i64: 1, 128>}, {pipeline_mode = #tpu.pipeline_mode<synchronous>, transform_indices = @transform_3, window_bounds = array<i64: 128, 128>}, {pipeline_mode = #tpu.pipeline_mode<synchronous>, transform_indices = @transform_4, window_bounds = array<i64: 1, 128>}, {transform_indices = @transform_5, window_bounds = array<i64: 128, 128>}]} {
    %c0 = arith.constant 0 : index
    %c0_0 = arith.constant 0 : index
    %0 = vector.load %arg1[%c0, %c0_0] : memref<128x128xbf16, #tpu.memory_space<vmem>>, vector<128x128xbf16>
    %c0_1 = arith.constant 0 : index
    %c0_2 = arith.constant 0 : index
    %1 = vector.load %arg2[%c0_1, %c0_2] : memref<128x128xbf16, #tpu.memory_space<vmem>>, vector<128x128xbf16>
    %cst = arith.constant dense<0.000000e+00> : vector<128x128xf32>
    %2 = tpu.matmul %0, %1, %cst {dimension_numbers = #tpu.dot_dimension_numbers<[1], [0], [0], [1], [0, 0, 1, 1], [], []>} : vector<128x128xbf16>, vector<128x128xbf16>, vector<128x128xf32> -> vector<128x128xf32>
    %c0_3 = arith.constant 0 : index
    %c0_4 = arith.constant 0 : index
    %3 = vector.load %arg3[%c0_3, %c0_4] : memref<1x128xf32, #tpu.memory_space<vmem>>, vector<1x128xf32>
    %4 = vector.broadcast %3 : vector<1x128xf32> to vector<128x128xf32>
    %5 = arith.addf %2, %4 : vector<128x128xf32>
    %cst_5 = arith.constant 0.000000e+00 : f32
    %6 = vector.broadcast %cst_5 : f32 to vector<128x128xf32>
    %7 = arith.maximumf %5, %6 : vector<128x128xf32>
    %8 = arith.truncf %7 : vector<128x128xf32> to vector<128x128xbf16>
    %c0_6 = arith.constant 0 : index
    %c0_7 = arith.constant 0 : index
    %9 = vector.load %arg7[%c0_6, %c0_7] : memref<128x128xbf16, #tpu.memory_space<vmem>>, vector<128x128xbf16>
    tpu.vector_store %arg7[%c0_6, %c0_7], %8 {strides = array<i32>} : memref<128x128xbf16, #tpu.memory_space<vmem>>, vector<128x128xbf16>,
    %c0_8 = arith.constant 0 : index
    %c0_9 = arith.constant 0 : index
    %10 = vector.load %arg7[%c0_8, %c0_9] : memref<128x128xbf16, #tpu.memory_space<vmem>>, vector<128x128xbf16>
    %c0_10 = arith.constant 0 : index
    %c0_11 = arith.constant 0 : index
    %11 = vector.load %arg4[%c0_10, %c0_11] : memref<128x128xbf16, #tpu.memory_space<vmem>>, vector<128x128xbf16>
    %cst_12 = arith.constant dense<0.000000e+00> : vector<128x128xf32>
    %12 = tpu.matmul %10, %11, %cst_12 {dimension_numbers = #tpu.dot_dimension_numbers<[1], [0], [0], [1], [0, 0, 1, 1], [], []>} : vector<128x128xbf16>, vector<128x128xbf16>, vector<128x128xf32> -> vector<128x128xf32>
    %c0_13 = arith.constant 0 : index
    %c0_14 = arith.constant 0 : index
    %13 = vector.load %arg5[%c0_13, %c0_14] : memref<1x128xf32, #tpu.memory_space<vmem>>, vector<1x128xf32>
    %14 = vector.broadcast %13 : vector<1x128xf32> to vector<128x128xf32>
    %15 = arith.addf %12, %14 : vector<128x128xf32>
    %c0_15 = arith.constant 0 : index
    %c0_16 = arith.constant 0 : index
    %16 = vector.load %arg6[%c0_15, %c0_16] : memref<128x128xf32, #tpu.memory_space<vmem>>, vector<128x128xf32>
    tpu.vector_store %arg6[%c0_15, %c0_16], %15 {strides = array<i32>} : memref<128x128xf32, #tpu.memory_space<vmem>>, vector<128x128xf32>,
    return
  }
  func.func @transform_0(%arg0: i32) -> (i32, i32) {
    %c0_i32 = arith.constant 0 : i32
    %c0_i32_0 = arith.constant 0 : i32
    return %arg0, %c0_i32 : i32, i32
  }
  func.func @transform_1(%arg0: i32) -> (i32, i32) {
    %c0_i32 = arith.constant 0 : i32
    %c0_i32_0 = arith.constant 0 : i32
    %c0_i32_1 = arith.constant 0 : i32
    return %c0_i32, %c0_i32_0 : i32, i32
  }
  func.func @transform_2(%arg0: i32) -> (i32, i32) {
    %c0_i32 = arith.constant 0 : i32
    %c0_i32_0 = arith.constant 0 : i32
    %c0_i32_1 = arith.constant 0 : i32
    return %c0_i32, %c0_i32_0 : i32, i32
  }
  func.func @transform_3(%arg0: i32) -> (i32, i32) {
    %c0_i32 = arith.constant 0 : i32
    %c0_i32_0 = arith.constant 0 : i32
    %c0_i32_1 = arith.constant 0 : i32
    return %c0_i32, %c0_i32_0 : i32, i32
  }
  func.func @transform_4(%arg0: i32) -> (i32, i32) {
    %c0_i32 = arith.constant 0 : i32
    %c0_i32_0 = arith.constant 0 : i32
    %c0_i32_1 = arith.constant 0 : i32
    return %c0_i32, %c0_i32_0 : i32, i32
  }
  func.func @transform_5(%arg0: i32) -> (i32, i32) {
    %c0_i32 = arith.constant 0 : i32
    %c0_i32_0 = arith.constant 0 : i32
    return %arg0, %c0_i32 : i32, i32
  }
}

</mosaic_0001>

<bundles_post_ra>
// kernel: mlp_forward.1
= control target key start
LH: loop header
LB: loop body
LE: loop exit
PB: predicated region body
PF: predicated region fallthrough
CT: control target
= control target key end

     0   :  { %10 = vsyncpa [#allocation4], 0  ;;  %s669_s18 = smov [#allocation3]   ;;  %s816_s0 = inlined_call_operand.vmem [shape: bf16[128,128], index: 0, kind: input, shape index: {}]   ;;  %s817_s1 = inlined_call_operand.vmem [shape: bf16[128,128], index: 1, kind: input, shape index: {}]   ;;  %s818_s2 = inlined_call_operand.vmem [shape: f32[1,128], index: 2, kind: input, shape index: {}]   ;;  %s819_s3 = inlined_call_operand.hbm [shape: bf16[128,128], index: 3, kind: input, shape index: {}]   ;;  %s820_s4 = inlined_call_operand.vmem [shape: f32[1,128], index: 4, kind: input, shape index: {}]   ;;  %s821_s5 = inlined_call_operand.vmem [shape: f32[128,128], index: 5, kind: output, shape index: {}]  }
   0x1   :  { %s22_s19 = sshll.u32 %s669_s18, 4  ;;  %s645_s22 = scalar_lea.hbm %s819_s3, 1024  ;;  %s23_s19 = int_to_ptr.vmem [resolvable:$true] %s22_s19 }
   0x2   :  { %p646_p0 = scmp.ne.s32.totalorder %s819_s3, %s645_s22  ;;  %p649_p1 = scmp.lt.u32.totalorder %s645_s22, %s819_s3 }
   0x4   :  { %p651_p2 = pnand %p649_p1, %p646_p0 }
   0x6   :  { %654 = shalt.err (!%p651_p2)
}
   0x7   :  { %s655_s27 = scalar_lea.vmem %s23_s19, 1024  ;;  %p660_p4 = scmp.lt.s32.totalorder %s23_s19, %s23_s19 }
   0x8   :  { %p656_p3 = scmp.ne.s32.totalorder %s23_s19, %s655_s27  ;;  %p661_p5 = scmp.lt.s32.totalorder %s655_s27, %s655_s27 }
   0xa   :  { %p662_p6 = por %p661_p5, %p660_p4 }
   0xc   :  { %p663_p7 = pnand %p662_p6, %p656_p3 }
   0xe   :  { %666 = shalt.err (!%p663_p7)
}
   0xf   :  { %s670_s28 = smov 64   ;;  %s671_s29 = smov 4  }
  0x10   :  { %28 = dma.hbm_to_vmem [thread:$0]  %s819_s3, 1024, %s23_s19, [#allocation4], %s670_s28, %s670_s28, %s671_s29  }
  0x11   :  { %667 = dma.done.wait [#allocation4], 1024  }
  0x12   :  { %668 = vsyncadd [#allocation4], 4294966272  ;;  %v621_v0 = vld [vmem:[%s817_s1] sm:$0xff]   ;;  %v622_v1 = vld [vmem:[%s817_s1 + $0x8] sm:$0xff]  }
  0x13   :  { %554 = vmatprep.subr.bf16.mxu0 %v621_v0  ;;  %v623_v2 = vld [vmem:[%s817_s1 + $0x10] sm:$0xff]   ;;  %v624_v3 = vld [vmem:[%s817_s1 + $0x18] sm:$0xff]   ;;  %v629_v4 = vld [vmem:[%s816_s0] sm:$0xff]  }
  0x14   :  { %555 = vmatpush3.bf16.msra.mxu0 %v621_v0  ;;  %570 = vmatprep.mubr.bf16.mxu0 %v629_v4  ;;  %v625_v5 = vld [vmem:[%s817_s1 + $0x20] sm:$0xff]   ;;  %v626_v6 = vld [vmem:[%s817_s1 + $0x28] sm:$0xff]   ;;  %v627_v9 = vld [vmem:[%s817_s1 + $0x30] sm:$0xff]  }
  0x15   :  { %556 = vmatprep.subr.bf16.mxu0 %v622_v1  ;;  %v637_v7 = vld [vmem:[#allocation3] sm:$0xff]   ;;  %v638_v8 = vld [vmem:[#allocation3 + $0x8] sm:$0xff]   ;;  %v639_v10 = vld [vmem:[#allocation3 + $0x10] sm:$0xff]  }
  0x16   :  { %586 = vmatprep.subr.bf16.mxu1 %v637_v7  ;;  %v628_v11 = vld [vmem:[%s817_s1 + $0x38] sm:$0xff]   ;;  %v641_v13 = vld [vmem:[#allocation3 + $0x20] sm:$0xff]   ;;  %v630_v14 = vld [vmem:[%s816_s0 + $0x8] sm:$0xff]  }
  0x17   :  { %587 = vmatpush3.bf16.msra.mxu1 %v637_v7  ;;  %v640_v12 = vld [vmem:[#allocation3 + $0x18] sm:$0xff]   ;;  %v631_v15 = vld [vmem:[%s816_s0 + $0x10] sm:$0xff]   ;;  %v642_v16 = vld [vmem:[#allocation3 + $0x28] sm:$0xff]  }
  0x18   :  { %557 = vmatpush3.bf16.msra.mxu0 %v622_v1  ;;  %588 = vmatprep.subr.bf16.mxu1 %v638_v8  ;;  %v632_v17 = vld [vmem:[%s816_s0 + $0x18] sm:$0xff]   ;;  %v633_v18 = vld [vmem:[%s816_s0 + $0x20] sm:$0xff]   ;;  %v634_v19 = vld [vmem:[%s816_s0 + $0x28] sm:$0xff]  }
  0x19   :  { %558 = vmatprep.subr.bf16.mxu0 %v623_v2  ;;  %v635_v20 = vld [vmem:[%s816_s0 + $0x30] sm:$0xff]   ;;  %v636_v21 = vld [vmem:[%s816_s0 + $0x38] sm:$0xff]   ;;  %v496_v24 = vld [vmem:[%s818_s2] ss:$0 sm:$0xff] }
  0x1a   :  { %v643_v22 = vld [vmem:[#allocation3 + $0x30] sm:$0xff]   ;;  %v644_v23 = vld [vmem:[#allocation3 + $0x38] sm:$0xff]  }
  0x1b   :  { %589 = vmatpush3.bf16.msra.mxu1 %v638_v8 }
  0x1c   :  { %559 = vmatpush3.bf16.msra.mxu0 %v623_v2  ;;  %590 = vmatprep.subr.bf16.mxu1 %v639_v10 }
  0x1d   :  { %560 = vmatprep.subr.bf16.mxu0 %v624_v3 }
  0x1f   :  { %591 = vmatpush3.bf16.msra.mxu1 %v639_v10 }
  0x20   :  { %561 = vmatpush3.bf16.msra.mxu0 %v624_v3  ;;  %592 = vmatprep.subr.bf16.mxu1 %v640_v12 }
  0x21   :  { %562 = vmatprep.subr.bf16.mxu0 %v625_v5 }
  0x23   :  { %593 = vmatpush3.bf16.msra.mxu1 %v640_v12 }
  0x24   :  { %563 = vmatpush3.bf16.msra.mxu0 %v625_v5  ;;  %594 = vmatprep.subr.bf16.mxu1 %v641_v13 }
  0x25   :  { %564 = vmatprep.subr.bf16.mxu0 %v626_v6 }
  0x27   :  { %595 = vmatpush3.bf16.msra.mxu1 %v641_v13 }
  0x28   :  { %565 = vmatpush3.bf16.msra.mxu0 %v626_v6  ;;  %596 = vmatprep.subr.bf16.mxu1 %v642_v16 }
  0x29   :  { %566 = vmatprep.subr.bf16.mxu0 %v627_v9 }
  0x2b   :  { %597 = vmatpush3.bf16.msra.mxu1 %v642_v16 }
  0x2c   :  { %567 = vmatpush3.bf16.msra.mxu0 %v627_v9  ;;  %598 = vmatprep.subr.bf16.mxu1 %v643_v22 }
  0x2d   :  { %568 = vmatprep.subr.bf16.mxu0 %v628_v11 }
  0x2f   :  { %599 = vmatpush3.bf16.msra.mxu1 %v643_v22 }
  0x30   :  { %569 = vmatpush3.bf16.msra.mxu0 %v628_v11  ;;  %600 = vmatprep.subr.bf16.mxu1 %v644_v23 }
  0x33   :  { %571 = vmatmul.mubr.bf16.vlgmr.msra.gmra.mrb[0].mxu0 %v630_v14  ;;  %601 = vmatpush3.bf16.msra.mxu1 %v644_v23 }
  0x34   :  { %574 = vmatprep.mubr.bf16.mxu0 %v631_v15 }
  0x3b   :  { %575 = vmatmul.mubr.bf16.gmra.mrb[4].mxu0 %v632_v17  ;;  %v513_v17 = vld [vmem:[%s820_s4] ss:$0 sm:$0xff] }
  0x3c   :  { %578 = vmatprep.mubr.bf16.mxu0 %v633_v18 }
  0x43   :  { %579 = vmatmul.mubr.bf16.gmra.mrb[8].mxu0 %v634_v19 }
  0x44   :  { %582 = vmatprep.mubr.bf16.mxu0 %v635_v20 }
  0x4b   :  { %583 = vmatmul.mubr.bf16.gmra.mrb[12].mxu0 %v636_v21 }
 0x106   :  { %v572_v25 = vpop.f32.mrb[0].mxu0 }
 0x107   :  { %v213_v26 = vadd.f32 %v572_v25, %v496_v24  ;;  %v204_v27 = vpop.f32.mrb[1].mxu0 }
 0x108   :  { %v205_v28 = vadd.f32 %v496_v24, %v204_v27  ;;  %v573_v29 = vpop.f32.mrb[2].mxu0 }
 0x109   :  { %v216_v30 = vadd.f32 %v573_v29, %v496_v24  ;;  %v207_v31 = vpop.f32.mrb[3].mxu0  ;;  %v269_v33 = vmax.f32 %v213_v26, 0.0 }
 0x10a   :  { %v208_v32 = vadd.f32 %v496_v24, %v207_v31  ;;  %v267_v35 = vmax.f32 %v205_v28, 0.0 }
 0x10b   :  { %v270_v34 = vmax.f32 %v216_v30, 0.0 }
 0x10c   :  { %v268_v36 = vmax.f32 %v208_v32, 0.0 }
 0x10d   :  { %v284_v37 = vpack.c.bf16 %v270_v34, %v269_v33 }
 0x10e   :  { %v576_v38 = vpop.f32.mrb[4].mxu0  ;;  %v283_v39 = vpack.c.bf16 %v268_v36, %v267_v35 }
 0x10f   :  { %v229_v40 = vadd.f32 %v576_v38, %v496_v24  ;;  %v220_v41 = vpop.f32.mrb[5].mxu0 }
 0x110   :  { %v221_v42 = vadd.f32 %v496_v24, %v220_v41  ;;  %v577_v43 = vpop.f32.mrb[6].mxu0  ;;  %602 = vmatprep.mubr.bf16.mxu1 %v283_v39 }
 0x111   :  { %v232_v44 = vadd.f32 %v577_v43, %v496_v24  ;;  %v223_v45 = vpop.f32.mrb[7].mxu0  ;;  %603 = vmatmul.mubr.bf16.vlgmr.msra.gmra.mrb[0].mxu1 %v284_v37  ;;  %v273_v47 = vmax.f32 %v229_v40, 0.0 }
 0x112   :  { %v224_v46 = vadd.f32 %v496_v24, %v223_v45  ;;  %v271_v49 = vmax.f32 %v221_v42, 0.0 }
 0x113   :  { %v274_v48 = vmax.f32 %v232_v44, 0.0 }
 0x114   :  { %v272_v50 = vmax.f32 %v224_v46, 0.0 }
 0x115   :  { %v286_v51 = vpack.c.bf16 %v274_v48, %v273_v47 }
 0x116   :  { %v285_v52 = vpack.c.bf16 %v272_v50, %v271_v49  ;;  %v580_v53 = vpop.f32.mrb[8].mxu0 }
 0x117   :  { %v245_v54 = vadd.f32 %v580_v53, %v496_v24  ;;  %v236_v55 = vpop.f32.mrb[9].mxu0 }
 0x118   :  { %v237_v56 = vadd.f32 %v496_v24, %v236_v55  ;;  %v581_v57 = vpop.f32.mrb[10].mxu0  ;;  %606 = vmatprep.mubr.bf16.mxu1 %v285_v52 }
 0x119   :  { %v248_v58 = vadd.f32 %v581_v57, %v496_v24  ;;  %v239_v59 = vpop.f32.mrb[11].mxu0  ;;  %607 = vmatmul.mubr.bf16.gmra.mrb[4].mxu1 %v286_v51  ;;  %v277_v61 = vmax.f32 %v245_v54, 0.0 }
 0x11a   :  { %v240_v60 = vadd.f32 %v496_v24, %v239_v59  ;;  %v275_v63 = vmax.f32 %v237_v56, 0.0 }
 0x11b   :  { %v278_v62 = vmax.f32 %v248_v58, 0.0 }
 0x11c   :  { %v276_v0 = vmax.f32 %v240_v60, 0.0 }
 0x11d   :  { %v288_v1 = vpack.c.bf16 %v278_v62, %v277_v61 }
 0x11e   :  { %v287_v2 = vpack.c.bf16 %v276_v0, %v275_v63  ;;  %v584_v3 = vpop.f32.mrb[12].mxu0 }
 0x11f   :  { %v261_v4 = vadd.f32 %v584_v3, %v496_v24  ;;  %v252_v5 = vpop.f32.mrb[13].mxu0 }
 0x120   :  { %v253_v6 = vadd.f32 %v496_v24, %v252_v5  ;;  %v585_v7 = vpop.f32.mrb[14].mxu0  ;;  %610 = vmatprep.mubr.bf16.mxu1 %v287_v2 }
 0x121   :  { %v264_v8 = vadd.f32 %v585_v7, %v496_v24  ;;  %v255_v9 = vpop.f32.mrb[15].mxu0  ;;  %611 = vmatmul.mubr.bf16.gmra.mrb[8].mxu1 %v288_v1  ;;  %v281_v11 = vmax.f32 %v261_v4, 0.0 }
 0x122   :  { %v256_v10 = vadd.f32 %v496_v24, %v255_v9  ;;  %v279_v13 = vmax.f32 %v253_v6, 0.0 }
 0x123   :  { %v282_v12 = vmax.f32 %v264_v8, 0.0 }
 0x124   :  { %v280_v14 = vmax.f32 %v256_v10, 0.0 }
 0x125   :  { %v290_v15 = vpack.c.bf16 %v282_v12, %v281_v11 }
 0x126   :  { %v289_v16 = vpack.c.bf16 %v280_v14, %v279_v13 }
 0x128   :  { %614 = vmatprep.mubr.bf16.mxu1 %v289_v16 }
 0x129   :  { %615 = vmatmul.mubr.bf16.gmra.mrb[12].mxu1 %v290_v15 }
 0x1e4   :  { %v604_v18 = vpop.f32.mrb[0].mxu1 }
 0x1e5   :  { %v421_v19 = vadd.f32 %v604_v18, %v513_v17  ;;  %v412_v20 = vpop.f32.mrb[1].mxu1 }
 0x1e6   :  { %v413_v21 = vadd.f32 %v513_v17, %v412_v20  ;;  %v605_v22 = vpop.f32.mrb[2].mxu1 }
 0x1e7   :  { %477 = vst [vmem:[%s821_s5 + $0x10] sm:$0xff] %v421_v19  ;;  %v424_v23 = vadd.f32 %v605_v22, %v513_v17  ;;  %v415_v24 = vpop.f32.mrb[3].mxu1 }
 0x1e8   :  { %475 = vst [vmem:[%s821_s5] sm:$0xff] %v413_v21  ;;  %v416_v25 = vadd.f32 %v513_v17, %v415_v24 }
 0x1e9   :  { %478 = vst [vmem:[%s821_s5 + $0x18] sm:$0xff] %v424_v23 }
 0x1ea   :  { %476 = vst [vmem:[%s821_s5 + $0x8] sm:$0xff] %v416_v25 }
 0x1ec   :  { %v608_v26 = vpop.f32.mrb[4].mxu1 }
 0x1ed   :  { %v437_v27 = vadd.f32 %v608_v26, %v513_v17  ;;  %v428_v28 = vpop.f32.mrb[5].mxu1 }
 0x1ee   :  { %v429_v29 = vadd.f32 %v513_v17, %v428_v28  ;;  %v609_v30 = vpop.f32.mrb[6].mxu1 }
 0x1ef   :  { %481 = vst [vmem:[%s821_s5 + $0x30] sm:$0xff] %v437_v27  ;;  %v440_v31 = vadd.f32 %v609_v30, %v513_v17  ;;  %v431_v32 = vpop.f32.mrb[7].mxu1 }
 0x1f0   :  { %479 = vst [vmem:[%s821_s5 + $0x20] sm:$0xff] %v429_v29  ;;  %v432_v33 = vadd.f32 %v513_v17, %v431_v32 }
 0x1f1   :  { %482 = vst [vmem:[%s821_s5 + $0x38] sm:$0xff] %v440_v31 }
 0x1f2   :  { %480 = vst [vmem:[%s821_s5 + $0x28] sm:$0xff] %v432_v33 }
 0x1f4   :  { %v612_v34 = vpop.f32.mrb[8].mxu1 }
 0x1f5   :  { %v453_v35 = vadd.f32 %v612_v34, %v513_v17  ;;  %v444_v36 = vpop.f32.mrb[9].mxu1 }
 0x1f6   :  { %v445_v37 = vadd.f32 %v513_v17, %v444_v36  ;;  %v613_v38 = vpop.f32.mrb[10].mxu1 }
 0x1f7   :  { %485 = vst [vmem:[%s821_s5 + $0x50] sm:$0xff] %v453_v35  ;;  %v456_v39 = vadd.f32 %v613_v38, %v513_v17  ;;  %v447_v40 = vpop.f32.mrb[11].mxu1 }
 0x1f8   :  { %483 = vst [vmem:[%s821_s5 + $0x40] sm:$0xff] %v445_v37  ;;  %v448_v41 = vadd.f32 %v513_v17, %v447_v40 }
 0x1f9   :  { %486 = vst [vmem:[%s821_s5 + $0x58] sm:$0xff] %v456_v39 }
 0x1fa   :  { %484 = vst [vmem:[%s821_s5 + $0x48] sm:$0xff] %v448_v41 }
 0x1fc   :  { %v616_v42 = vpop.f32.mrb[12].mxu1 }
 0x1fd   :  { %v469_v43 = vadd.f32 %v616_v42, %v513_v17  ;;  %v460_v44 = vpop.f32.mrb[13].mxu1 }
 0x1fe   :  { %v461_v45 = vadd.f32 %v513_v17, %v460_v44  ;;  %v617_v46 = vpop.f32.mrb[14].mxu1 }
 0x1ff   :  { %489 = vst [vmem:[%s821_s5 + $0x70] sm:$0xff] %v469_v43  ;;  %v472_v47 = vadd.f32 %v617_v46, %v513_v17  ;;  %v463_v48 = vpop.f32.mrb[15].mxu1 }
 0x200   :  { %487 = vst [vmem:[%s821_s5 + $0x60] sm:$0xff] %v461_v45  ;;  %v464_v49 = vadd.f32 %v513_v17, %v463_v48 }
 0x201   :  { %490 = vst [vmem:[%s821_s5 + $0x78] sm:$0xff] %v472_v47 }
 0x202   :  { %488 = vst [vmem:[%s821_s5 + $0x68] sm:$0xff] %v464_v49 }
 0x203   :  { %495 = vsyncpa [#allocation4], 1 }

</bundles_post_ra>
